<compile_context>
chip_gen: v7x
topology: tpu7x:2x2x1
jax: 0.10.0
libtpu: 0.0.40
codegen_flags: <defaults>
</compile_context>

<pallas_src>
import jax
import jax.numpy as jnp
from jax.experimental import pallas as pl
from jax.experimental.pallas import tpu as pltpu


def _minus_one_kernel(x_ref, o_ref):
    # Pure VPU elementwise op over the whole VMEM tile.
    o_ref[...] = x_ref[...] - jnp.asarray(1.0, dtype=x_ref.dtype)


def _minus_one_2d(x2d: jax.Array, tile_rows: int, cost: pl.CostEstimate) -> jax.Array:
    rows, cols = x2d.shape
    grid = (pl.cdiv(rows, tile_rows),)
    return pl.pallas_call(
        _minus_one_kernel,
        out_shape=jax.ShapeDtypeStruct((rows, cols), x2d.dtype),
        grid_spec=pltpu.PrefetchScalarGridSpec(
            num_scalar_prefetch=0,
            grid=grid,
            in_specs=[pl.BlockSpec((tile_rows, cols), lambda i: (i, 0))],
            out_specs=pl.BlockSpec((tile_rows, cols), lambda i: (i, 0)),
        ),
        compiler_params=pltpu.CompilerParams(
            dimension_semantics=("parallel",),
        ),
        cost_estimate=cost,
    )(x2d)


def minus_one(x: jax.Array) -> jax.Array:
    """Computes x - 1.0 elementwise with a tiled, HBM-bandwidth-bound Pallas kernel."""
    orig_shape = x.shape
    dtype = x.dtype
    n = x.size
    if n == 0:
        return x
    itemsize = jnp.dtype(dtype).itemsize

    # Memory-bound: read n + write n elements, n "flops" (subtracts).
    cost = pl.CostEstimate(flops=n, transcendentals=0, bytes_accessed=2 * n * itemsize)

    # Widest lane-dense column width that divides the flat size -> free reshape,
    # no pad, no tail slice.
    cols = None
    for cand in (1024, 512, 256, 128):
        if n % cand == 0:
            cols = cand
            break

    if cols is None:
        # Rare irregular-size fallback (flat size not a multiple of 128):
        # pad up to 128 and slice the tail off afterwards.
        cols = 128
        n_pad = pl.cdiv(n, cols) * cols
        x_flat = jnp.concatenate(
            [jnp.ravel(x), jnp.zeros((n_pad - n,), dtype=dtype)]
        )
        rows = n_pad // cols
        tile_rows = max(8, ((2 * 1024 * 1024) // (cols * itemsize)) // 8 * 8)
        if rows <= tile_rows:
            tile_rows = rows
        out2d = _minus_one_2d(x_flat.reshape(rows, cols), tile_rows, cost)
        return out2d.reshape(-1)[:n].reshape(orig_shape)

    rows = n // cols
    x2d = jnp.ravel(x).reshape(rows, cols)  # metadata-only reshape, no copy

    # Target ~2 MiB per block (rounded to a multiple of 8 rows).
    target_block_bytes = 2 * 1024 * 1024
    tile_rows = max(8, (target_block_bytes // (cols * itemsize)) // 8 * 8)

    if rows <= tile_rows:
        # Small-input fast path: one grid step over the full array
        # (block_shape == full array dims, so no (8,128) rounding needed).
        tile_rows = rows

    out2d = _minus_one_2d(x2d, tile_rows, cost)
    return out2d.reshape(orig_shape)


if __name__ == "__main__":
    key = jax.random.PRNGKey(0)

    # NCHW, small shape matching the PyTorch module: batch=2, channels=4, 16x16.
    x = jax.random.normal(key, (2, 4, 16, 16), dtype=jnp.float32)
    y = jax.block_until_ready(minus_one(x))
    y_ref = x - 1.0
    assert y.shape == x.shape and y.dtype == x.dtype
    assert jnp.allclose(y, y_ref, atol=1e-6, rtol=1e-6)

    # Extra check: a shape whose flat size is not a multiple of 1024/512
    # (exercises the narrower lane-dense width selection).
    x2 = jax.random.normal(jax.random.PRNGKey(1), (4, 3, 40, 40), dtype=jnp.float32)
    y2 = jax.block_until_ready(minus_one(x2))
    assert jnp.allclose(y2, x2 - 1.0, atol=1e-6, rtol=1e-6)

    print("KERNEL_OK")
</pallas_src>

<mosaic_0001>
module attributes {stable_mosaic.version = 11 : i64} {
  func.func @_minus_one_kernel(%arg0: i32, %arg1: memref<2x1024xf32, #tpu.memory_space<vmem>>, %arg2: memref<2x1024xf32, #tpu.memory_space<vmem>>) attributes {dimension_semantics = [#tpu.dimension_semantics<parallel>], iteration_bounds = array<i64: 1>, scalar_prefetch = 0 : i64, scratch_operands = 0 : i64, tpu.core_type = #tpu.core_type<tc>, window_params = [{transform_indices = @transform_0, window_bounds = array<i64: 2, 1024>}, {transform_indices = @transform_1, window_bounds = array<i64: 2, 1024>}]} {
    %c0 = arith.constant 0 : index
    %c0_0 = arith.constant 0 : index
    %0 = vector.load %arg1[%c0, %c0_0] : memref<2x1024xf32, #tpu.memory_space<vmem>>, vector<2x1024xf32>
    %cst = arith.constant 1.000000e+00 : f32
    %1 = vector.broadcast %cst : f32 to vector<2x1024xf32>
    %2 = arith.subf %0, %1 : vector<2x1024xf32>
    %c0_1 = arith.constant 0 : index
    %c0_2 = arith.constant 0 : index
    %3 = vector.load %arg2[%c0_1, %c0_2] : memref<2x1024xf32, #tpu.memory_space<vmem>>, vector<2x1024xf32>
    tpu.vector_store %arg2[%c0_1, %c0_2], %2 {strides = array<i32>} : memref<2x1024xf32, #tpu.memory_space<vmem>>, vector<2x1024xf32>,
    return
  }
  func.func @transform_0(%arg0: i32) -> (i32, i32) {
    %c0_i32 = arith.constant 0 : i32
    %c0_i32_0 = arith.constant 0 : i32
    return %arg0, %c0_i32 : i32, i32
  }
  func.func @transform_1(%arg0: i32) -> (i32, i32) {
    %c0_i32 = arith.constant 0 : i32
    %c0_i32_0 = arith.constant 0 : i32
    return %arg0, %c0_i32 : i32, i32
  }
}

</mosaic_0001>

<bundles_post_ra>
// kernel: tpu_custom_call.1
= control target key start
LH: loop header
LB: loop body
LE: loop exit
PB: predicated region body
PF: predicated region fallthrough
CT: control target
= control target key end

     0   :  { %6 = vsyncpa [#allocation3], 0  ;;  %s130_s0 = inlined_call_operand.hbm [shape: f32[2,1024], index: 0, kind: input, shape index: {}]   ;;  %s131_s1 = inlined_call_operand.hbm [shape: f32[2,1024], index: 1, kind: output, shape index: {}]  }
   0x1   :  { %7 = vsyncpa [#allocation4], 0  ;;  %s94_s6 = smov [#allocation2]   ;;  %s46_s10 = scalar_lea.hbm %s130_s0, 256 }
   0x2   :  { %s14_s7 = sshll.u32 %s94_s6, 4  ;;  %p47_p0 = scmp.ne.s32.totalorder %s130_s0, %s46_s10  ;;  %s15_s7 = int_to_ptr.vmem [resolvable:$true] %s14_s7 }
   0x3   :  { %p50_p1 = scmp.lt.u32.totalorder %s46_s10, %s130_s0 }
   0x5   :  { %p52_p2 = pnand %p50_p1, %p47_p0 }
   0x7   :  { %55 = shalt.err (!%p52_p2)
}
   0x8   :  { %s56_s15 = scalar_lea.vmem %s15_s7, 256  ;;  %p61_p4 = scmp.lt.s32.totalorder %s15_s7, %s15_s7 }
   0x9   :  { %p57_p3 = scmp.ne.s32.totalorder %s15_s7, %s56_s15  ;;  %p62_p5 = scmp.lt.s32.totalorder %s56_s15, %s56_s15 }
   0xb   :  { %p63_p6 = por %p62_p5, %p61_p4 }
   0xd   :  { %p64_p7 = pnand %p63_p6, %p57_p3 }
   0xf   :  { %67 = shalt.err (!%p64_p7)
}
  0x10   :  { %17 = dma.hbm_to_vmem [thread:$0]  %s130_s0, 256, %s15_s7, [#allocation3]  }
  0x11   :  { %90 = dma.done.wait [#allocation3], 256  }
  0x12   :  { %91 = vsyncadd [#allocation3], 4294967040  ;;  %s95_s18 = smov [#allocation5]   ;;  %v21_v0 = vld [vmem:[#allocation2] sm:$0xff]  ;;  %v22_v1 = vld [vmem:[#allocation2 + $0x8] sm:$0xff] }
  0x13   :  { %s33_s19 = sshll.u32 %s95_s18, 4  ;;  %v42_v2 = vadd.f32 -1.0, %v21_v0  ;;  %v43_v3 = vadd.f32 -1.0, %v22_v1  ;;  %s34_s19 = int_to_ptr.vmem [resolvable:$true] %s33_s19 }
  0x14   :  { %s68_s20 = scalar_lea.vmem %s34_s19, 256  ;;  %p73_p9 = scmp.lt.s32.totalorder %s34_s19, %s34_s19 }
  0x15   :  { %25 = vst [vmem:[#allocation5] sm:$0xff] %v42_v2  ;;  %26 = vst [vmem:[#allocation5 + $0x8] sm:$0xff] %v43_v3  ;;  %p69_p8 = scmp.ne.s32.totalorder %s34_s19, %s68_s20  ;;  %p74_p10 = scmp.lt.s32.totalorder %s68_s20, %s68_s20 }
  0x17   :  { %p75_p11 = por %p74_p10, %p73_p9 }
  0x19   :  { %p76_p12 = pnand %p75_p11, %p69_p8 }
  0x1b   :  { %79 = shalt.err (!%p76_p12)
}
  0x1c   :  { %s80_s22 = scalar_lea.hbm %s131_s1, 256 }
  0x1d   :  { %p81_p13 = scmp.ne.s32.totalorder %s131_s1, %s80_s22  ;;  %p84_p0 = scmp.lt.u32.totalorder %s80_s22, %s131_s1 }
  0x1f   :  { %p86_p1 = pnand %p84_p0, %p81_p13 }
  0x21   :  { %89 = shalt.err (!%p86_p1)
}
  0x22   :  { %36 = dma.vmem_to_hbm [thread:$0]  %s34_s19, 256, %s131_s1, [#allocation4]  }
  0x23   :  { %92 = dma.done.wait [#allocation4], 256  }
  0x24   :  { %93 = vsyncadd [#allocation4], 4294967040 }
  0x25   :  { %40 = vsyncpa [#allocation3], 1 }
  0x26   :  { %41 = vsyncpa [#allocation4], 1 }

</bundles_post_ra>
